<compile_context>
chip_gen: v7x
topology: tpu7x:2x2x1
jax: 0.10.0
libtpu: 0.0.40
codegen_flags: <defaults>
</compile_context>

<pallas_src>
import jax
import jax.numpy as jnp
from jax import lax
from jax.experimental import pallas as pl
from jax.experimental.pallas import tpu as pltpu


def _round_up(x: int, m: int) -> int:
    return (x + m - 1) // m * m


def _pad_halves(arr, rank: int, rank_p: int):
    """(..., 2*rank) -> (..., 2*rank_p), laid out [re | 0 | im | 0] (lane-dense K)."""
    if rank_p == rank:
        return arr
    re, im = arr[..., :rank], arr[..., rank:]
    pad = [(0, 0)] * (arr.ndim - 1) + [(0, rank_p - rank)]
    return jnp.concatenate([jnp.pad(re, pad), jnp.pad(im, pad)], axis=-1)


# ---------------------------------------------------------------------------
# Pallas kernels: scores = q @ E^T, streaming the (N, K) entity table.
# ---------------------------------------------------------------------------
def _score_kernel(q_ref, e_ref, o_ref):
    # q: (B, K) resident across all grid steps; e: (tn, K) streamed tile.
    # Contract the shared feature axis in the stored layout (no transpose),
    # f32 accumulation on the MXU.
    o_ref[...] = lax.dot_general(
        q_ref[...], e_ref[...],
        dimension_numbers=(((1,), (1,)), ((), ())),
        preferred_element_type=jnp.float32,
    ).astype(o_ref.dtype)


def _score_kernel_int8(q_ref, e_ref, s_ref, o_ref):
    # int8 entity tile: half the HBM stream of bf16, a quarter of f32.
    # The per-entity scale is a per-OUTPUT-COLUMN scale, so it is applied to
    # the f32 result tile; the MXU itself only sees f32 operands (portable
    # across v5e/v6e/v7x regardless of native int8/fp8 MXU support).
    e = e_ref[...].astype(jnp.float32)
    acc = lax.dot_general(
        q_ref[...], e,
        dimension_numbers=(((1,), (1,)), ((), ())),
        preferred_element_type=jnp.float32,
    )
    o_ref[...] = (acc * s_ref[...]).astype(o_ref.dtype)


# ---------------------------------------------------------------------------
# Wrapper
# ---------------------------------------------------------------------------
def _choose_tile_rows(n_rows, k, table_elt_bytes, batch, out_elt_bytes,
                      target_tile_bytes, vmem_budget_bytes):
    if n_rows <= 128:
        return n_rows  # single full-extent tile (always layout-legal)
    # ~1-4 MiB of streamed table per grid step so the DMA time dominates the
    # ~0.35 us fixed per-grid-step overhead (tiny tiles were overhead-bound).
    tn = max(128, (target_tile_bytes // max(1, k * table_elt_bytes)) // 128 * 128)

    def footprint(t):  # double-buffered VMEM footprint of one grid step
        return 2 * (t * k * table_elt_bytes      # streamed entity tile
                    + batch * t * out_elt_bytes  # output tile
                    + t * 4)                     # per-entity scale row (int8 path)

    while tn > 128 and footprint(tn) > vmem_budget_bytes:
        tn -= 128
    # keep >= 2 grid steps so both v7x TensorCores get work on short tables
    tn = min(tn, max(128, _round_up(pl.cdiv(n_rows, 2), 128)))
    return tn


def complex_scores(q, table, scales=None, *,
                   target_tile_bytes=2 << 20,
                   vmem_budget_bytes=28 << 20,
                   out_dtype=jnp.float32):
    """scores = q @ table^T, streaming the (N, K) table in auto-sized row tiles."""
    B, K = q.shape
    N, K2 = table.shape
    assert K == K2, (q.shape, table.shape)

    table_elt = jnp.dtype(table.dtype).itemsize
    out_elt = jnp.dtype(out_dtype).itemsize
    q_bytes = B * K * jnp.dtype(q.dtype).itemsize

    tn = _choose_tile_rows(N, K, table_elt, B, out_elt,
                           target_tile_bytes, vmem_budget_bytes)
    grid = (pl.cdiv(N, tn),)

    # Double-buffered VMEM footprint of one grid step (+ resident q).
    footprint = 2 * (tn * K * table_elt + B * tn * out_elt + tn * 4) + 2 * q_bytes
    vmem_limit = int(min(max(footprint + (6 << 20), 16 << 20), 34 << 20))

    scale_bytes = N * 4 if scales is not None else 0
    cost = pl.CostEstimate(
        flops=2 * B * N * K,
        transcendentals=0,
        bytes_accessed=N * K * table_elt + B * N * out_elt + q_bytes + scale_bytes,
    )

    in_specs = [
        pl.BlockSpec((B, K), lambda j: (0, 0)),    # q stays resident
        pl.BlockSpec((tn, K), lambda j: (j, 0)),   # streamed entity tile
    ]
    operands = [q, table]
    if scales is not None:
        in_specs.append(pl.BlockSpec((1, tn), lambda j: (0, j)))  # per-entity scale
        operands.append(scales)
        kernel = _score_kernel_int8
    else:
        kernel = _score_kernel

    return pl.pallas_call(
        kernel,
        out_shape=jax.ShapeDtypeStruct((B, N), out_dtype),
        grid_spec=pltpu.PrefetchScalarGridSpec(
            num_scalar_prefetch=0,
            grid=grid,
            in_specs=in_specs,
            out_specs=pl.BlockSpec((B, tn), lambda j: (0, j)),
        ),
        compiler_params=pltpu.CompilerParams(
            dimension_semantics=("parallel",),   # megacore-shardable (v7x: 2 TCs)
            vmem_limit_bytes=vmem_limit,
        ),
        cost_estimate=cost,
    )(*operands)


# ---------------------------------------------------------------------------
# Model
# ---------------------------------------------------------------------------
class ModelMKGW:
    """JAX/Pallas port of the PyTorch `model_mkgw` module (forward only).

    table_mode:
      "f32"  : stream the entity table in f32 (closest to PyTorch f32 parity).
      "bf16" : (default) halves the dominant HBM stream; scores deviate only at
               bf16 input-rounding level, accumulation stays f32.  Documented
               deviation from exact f32 parity.
      "int8" : per-entity-scaled symmetric int8 table (4x smaller stream than
               f32); dequantized in-kernel -> portable across v5e/v6e/v7x.
    """

    def __init__(self, sizes, rank, init_size=0.001, key=None,
                 table_mode="bf16", out_dtype=jnp.float32,
                 target_tile_bytes=2 << 20):
        assert table_mode in ("f32", "bf16", "int8")
        self.sizes = sizes
        self.rank = rank
        self.rank_p = _round_up(rank, 64)        # 2*rank_p is a multiple of 128
        self.alpha = jnp.float32(0.5)
        self.gamma = jnp.float32(0.5)
        self.scale = 0.1
        self.table_mode = table_mode
        self.out_dtype = out_dtype               # bf16 here halves the (B,N) writeback
        self.target_tile_bytes = target_tile_bytes
        if key is None:
            key = jax.random.PRNGKey(0)
        k_ent, k_rel = jax.random.split(key)
        # nn.Embedding default init ~ N(0, 1), then scaled by init_size.
        self.ent_emb = (jax.random.normal(k_ent, (sizes[0], 2 * rank), jnp.float32)
                        * init_size)
        self.rel_emb = (jax.random.normal(k_rel, (sizes[1], 2 * rank), jnp.float32)
                        * init_size)
        # NOTE: on v5e (16 GiB HBM) one can drop the f32 master table and
        # gather/upcast lhs/rhs rows from the quantized scoring copy instead.
        self.refresh_scoring_table()

    def refresh_scoring_table(self):
        """(Re)build the padded / low-precision scoring copy of ent_emb.

        Must be called after any update to `ent_emb` (the copy is otherwise stale).
        """
        table = _pad_halves(self.ent_emb, self.rank, self.rank_p)
        if self.table_mode == "f32":
            self.ent_scoring, self.ent_scales = table, None
        elif self.table_mode == "bf16":
            self.ent_scoring, self.ent_scales = table.astype(jnp.bfloat16), None
        else:  # int8, symmetric per-entity scale
            amax = jnp.max(jnp.abs(table), axis=1, keepdims=True)
            scale = jnp.where(amax > 0, amax / 127.0, jnp.float32(1.0))
            self.ent_scoring = jnp.clip(
                jnp.round(table / scale), -127, 127).astype(jnp.int8)
            self.ent_scales = scale.reshape(1, -1).astype(jnp.float32)

    def forward(self, x, multi_modal=None):
        # multi_modal is accepted but unused, exactly like the PyTorch forward.
        r = self.rank
        lhs = self.ent_emb[x[:, 0]]
        rel = self.rel_emb[x[:, 1]]
        rhs = self.ent_emb[x[:, 2]]
        lhs_re, lhs_im = lhs[:, :r], lhs[:, r:]
        rel_re, rel_im = rel[:, :r], rel[:, r:]
        rhs_re, rhs_im = rhs[:, :r], rhs[:, r:]

        # Tiny (B, 2R) prep stays in plain JAX (XLA fuses it); the
        # bandwidth-bound (B, N) scoring contraction is the Pallas kernel.
        q_re = lhs_re * rel_re - lhs_im * rel_im
        q_im = lhs_re * rel_im + lhs_im * rel_re
        q = _pad_halves(jnp.concatenate([q_re, q_im], axis=-1), r, self.rank_p)
        q = q.astype(jnp.bfloat16 if self.table_mode == "bf16" else jnp.float32)

        scores = complex_scores(q, self.ent_scoring, self.ent_scales,
                                target_tile_bytes=self.target_tile_bytes,
                                out_dtype=self.out_dtype)
        factors = (jnp.sqrt(lhs_re ** 2 + lhs_im ** 2),
                   jnp.sqrt(rel_re ** 2 + rel_im ** 2),
                   jnp.sqrt(rhs_re ** 2 + rhs_im ** 2))
        return scores, factors


# ---------------------------------------------------------------------------
# Pure-JAX reference and correctness checks
# ---------------------------------------------------------------------------
def _reference_forward(ent_emb, rel_emb, x, rank):
    """Faithful f32 reference replicating the PyTorch forward (HIGHEST matmuls)."""
    hp = lax.Precision.HIGHEST
    lhs = ent_emb[x[:, 0]]
    rel = rel_emb[x[:, 1]]
    rhs = ent_emb[x[:, 2]]
    lr, li = lhs[:, :rank], lhs[:, rank:]
    rr, ri = rel[:, :rank], rel[:, rank:]
    tr, ti = rhs[:, :rank], rhs[:, rank:]
    er, ei = ent_emb[:, :rank], ent_emb[:, rank:]
    scores = (jnp.matmul(lr * rr - li * ri, er.T, precision=hp)
              + jnp.matmul(lr * ri + li * rr, ei.T, precision=hp))
    factors = (jnp.sqrt(lr ** 2 + li ** 2),
               jnp.sqrt(rr ** 2 + ri ** 2),
               jnp.sqrt(tr ** 2 + ti ** 2))
    return scores, factors


if __name__ == "__main__":
    key = jax.random.PRNGKey(0)
    k_model, k_h, k_r, k_t = jax.random.split(key, 4)

    # Small shapes; n_ent=300 exercises a 2-step grid AND the masked ragged tail.
    n_ent, n_rel, rank, batch = 300, 16, 32, 8

    x = jnp.stack(
        [jax.random.randint(k_h, (batch,), 0, n_ent),
         jax.random.randint(k_r, (batch,), 0, n_rel),
         jax.random.randint(k_t, (batch,), 0, n_ent)],
        axis=1).astype(jnp.int32)

    # --- f32 table path ------------------------------------------------------
    m32 = ModelMKGW((n_ent, n_rel, n_ent), rank, key=k_model, table_mode="f32")
    s32, f32s = m32.forward(x)
    jax.block_until_ready(s32)
    ref_s, ref_f = _reference_forward(m32.ent_emb, m32.rel_emb, x, rank)
    # Tolerance accounts for possibly different MXU pass counts between the
    # kernel's and XLA's f32 matmul; structural bugs are orders of magnitude larger.
    assert jnp.allclose(s32, ref_s, rtol=2e-2, atol=1e-9), "f32 scores mismatch"
    for a, b in zip(f32s, ref_f):
        assert jnp.allclose(a, b, rtol=1e-6, atol=0.0), "factor mismatch"

    # --- default bf16 table path ----------------------------------------------
    mbf = ModelMKGW((n_ent, n_rel, n_ent), rank, key=k_model)  # table_mode="bf16"
    sbf, fbf = mbf.forward(x)
    jax.block_until_ready(sbf)
    lhs = mbf.ent_emb[x[:, 0]]
    rel = mbf.rel_emb[x[:, 1]]
    q_f32 = jnp.concatenate(
        [lhs[:, :rank] * rel[:, :rank] - lhs[:, rank:] * rel[:, rank:],
         lhs[:, :rank] * rel[:, rank:] + lhs[:, rank:] * rel[:, :rank]], axis=-1)
    ref_bf = lax.dot_general(q_f32.astype(jnp.bfloat16),
                             mbf.ent_emb.astype(jnp.bfloat16),
                             (((1,), (1,)), ((), ())),
                             preferred_element_type=jnp.float32)
    assert jnp.allclose(sbf, ref_bf, rtol=1e-3, atol=1e-11), "bf16 scores mismatch"
    assert jnp.allclose(sbf, ref_s, rtol=1e-1, atol=2e-9), "bf16 path far from f32 ref"
    for a, b in zip(fbf, ref_f):
        assert jnp.allclose(a, b, rtol=1e-6, atol=0.0), "factor mismatch (bf16 model)"

    # --- int8 table path (low-precision streaming for v5e/v6e/v7x) ------------
    m8 = ModelMKGW((n_ent, n_rel, n_ent), rank, key=k_model, table_mode="int8")
    s8, _ = m8.forward(x)
    jax.block_until_ready(s8)
    deq = m8.ent_scoring.astype(jnp.float32) * m8.ent_scales.reshape(-1, 1)
    q_p = _pad_halves(q_f32, rank, m8.rank_p)
    ref_8 = lax.dot_general(q_p, deq, (((1,), (1,)), ((), ())),
                            precision=lax.Precision.HIGHEST,
                            preferred_element_type=jnp.float32)
    assert jnp.allclose(s8, ref_8, rtol=2e-2, atol=1e-9), "int8 scores mismatch"

    print("KERNEL_OK")
</pallas_src>

<mosaic_0001>
module attributes {stable_mosaic.version = 11 : i64} {
  func.func @_score_kernel(%arg0: i32, %arg1: memref<8x128xf32, #tpu.memory_space<vmem>>, %arg2: memref<256x128xf32, #tpu.memory_space<vmem>>, %arg3: memref<8x256xf32, #tpu.memory_space<vmem>>) attributes {dimension_semantics = [#tpu.dimension_semantics<parallel>], iteration_bounds = array<i64: 2>, scalar_prefetch = 0 : i64, scratch_operands = 0 : i64, tpu.core_type = #tpu.core_type<tc>, window_params = [{pipeline_mode = #tpu.pipeline_mode<synchronous>, transform_indices = @transform_0, window_bounds = array<i64: 8, 128>}, {transform_indices = @transform_1, window_bounds = array<i64: 256, 128>}, {transform_indices = @transform_2, window_bounds = array<i64: 8, 256>}]} {
    %c0 = arith.constant 0 : index
    %c0_0 = arith.constant 0 : index
    %0 = vector.load %arg1[%c0, %c0_0] : memref<8x128xf32, #tpu.memory_space<vmem>>, vector<8x128xf32>
    %c0_1 = arith.constant 0 : index
    %c0_2 = arith.constant 0 : index
    %1 = vector.load %arg2[%c0_1, %c0_2] : memref<256x128xf32, #tpu.memory_space<vmem>>, vector<256x128xf32>
    %cst = arith.constant dense<0.000000e+00> : vector<8x256xf32>
    %2 = tpu.matmul %0, %1, %cst {dimension_numbers = #tpu.dot_dimension_numbers<[1], [1], [0], [0], [0, 0, 1, 0], [], []>} : vector<8x128xf32>, vector<256x128xf32>, vector<8x256xf32> -> vector<8x256xf32>
    %c0_3 = arith.constant 0 : index
    %c0_4 = arith.constant 0 : index
    %3 = vector.load %arg3[%c0_3, %c0_4] : memref<8x256xf32, #tpu.memory_space<vmem>>, vector<8x256xf32>
    tpu.vector_store %arg3[%c0_3, %c0_4], %2 {strides = array<i32>} : memref<8x256xf32, #tpu.memory_space<vmem>>, vector<8x256xf32>,
    return
  }
  func.func @transform_0(%arg0: i32) -> (i32, i32) {
    %c0_i32 = arith.constant 0 : i32
    %c0_i32_0 = arith.constant 0 : i32
    %c0_i32_1 = arith.constant 0 : i32
    return %c0_i32, %c0_i32_0 : i32, i32
  }
  func.func @transform_1(%arg0: i32) -> (i32, i32) {
    %c0_i32 = arith.constant 0 : i32
    %c0_i32_0 = arith.constant 0 : i32
    return %arg0, %c0_i32 : i32, i32
  }
  func.func @transform_2(%arg0: i32) -> (i32, i32) {
    %c0_i32 = arith.constant 0 : i32
    %c0_i32_0 = arith.constant 0 : i32
    return %c0_i32, %arg0 : i32, i32
  }
}

</mosaic_0001>

<bundles_post_ra>
// kernel: tpu_custom_call.1
= control target key start
LH: loop header
LB: loop body
LE: loop exit
PB: predicated region body
PF: predicated region fallthrough
CT: control target
= control target key end

     0   :  { %7 = vsyncpa [#allocation3], 0  ;;  %s933_s0 = inlined_call_operand.hbm [shape: f32[8,128], index: 0, kind: input, shape index: {}]   ;;  %s934_s1 = inlined_call_operand.hbm [shape: f32[300,128], index: 1, kind: input, shape index: {}]   ;;  %s935_s2 = inlined_call_operand.hbm [shape: f32[8,300], index: 2, kind: output, shape index: {}]  }
   0x1   :  { %8 = vsyncpa [#allocation6], 0 }
   0x2   :  { %10 = vsyncpa [#allocation6 + $0x1], 0 }
   0x3   :  { %11 = vsyncpa [#allocation4], 0 }
   0x4   :  { %13 = vsyncpa [#allocation4 + $0x1], 0  ;;  %s692_s9 = smov 0   ;;  %s694_s10 = smov 0  }
   0x5   :  { %s696_s11 = smov 0   ;;  %s698_s12 = smov 0  }
   0x6 LB: > { %s713_s13 = sadd.s32 4294967295, %s670_s12   ;;  %s400_s14 = sadd.s32 4294967294, %s670_s12   ;;  %s670_s12 = sphi %s698_s12, %s955_s12   ;;  %s666_s11 = sphi %s696_s11, %s954_s11   ;;  %s662_s10 = sphi %s694_s10, %s953_s10   ;;  %s658_s9 = sphi %s692_s9, %s952_s9  }
   0x7   : > { %s717_s15 = sadd.s32 1, %s670_s12   ;;  %s47_s16 = sadd.s32 1, %s666_s11 }
   0x8   : > { %s44_s17 = ssub.s32 %s670_s12, %s717_s15  ;;  %p54_p0 = scmp.ne.s32.totalorder %s666_s11, %s662_s10 }
   0x9   : > { %p45_p1 = scmp.eq.s32.totalorder %s44_s17, 0  ;;  %p55_p2 = scmp.eq.s32.totalorder %s670_s12, 0 }
   0xa   : > { %p60_p3 = scmp.ne.s32.totalorder %s662_s10, %s658_s9  ;;  %p936_p4 = scmp.eq.s32.totalorder %s713_s13, 0 }
   0xb   : > { %s729_s18 = scalar_select %p45_p1, %s666_s11, %s47_s16  }
   0xc   : > { %p731_p5 = por %p55_p2, %p54_p0  ;;  %p737_p6 = por %p936_p4, %p60_p3 }
   0xd   : > { %p84_p7 = scmp.eq.s32.totalorder %s713_s13, 1  ;;  %p90_p8 = scmp.eq.s32.totalorder %s400_s14, 1 }
   0xe   : > { %s939_s19 = scalar_select %p731_p5, 1, 0 }
   0xf   : > { %s940_s20 = scalar_select %p737_p6, 1, 0 }
  0x10   : > { %p401_p9 = scmp.ge.s32.totalorder %s670_s12, 1  ;;  %p97_p10 = scmp.lt.s32.totalorder %s670_s12, 3 }
  0x11   : > { %p744_p11 = por %p84_p7, %p54_p0  ;;  %p748_p12 = por %p90_p8, %p60_p3 }
  0x12   : > { %p752_p13 = pnand %p401_p9, %p97_p10  ;;  %s672_s24 = smov [#allocation2]  }
  0x13   : > { %s941_s21 = scalar_select %p744_p11, 1, 0 }
  0x14   : > { %s942_s22 = scalar_select %p748_p12, 1, 0 }
  0x15   : > { %s943_s23 = scalar_select %p752_p13, 1, 0 }
  0x16   : > { %p498_p1 = pneg %p752_p13  ;;  %s110_s25 = sshll.u32 %s672_s24, 4  ;;  %s111_s25 = int_to_ptr.vmem [resolvable:$true] %s110_s25 }
  0x17   : > { %s544_s29 = scalar_lea.hbm %s933_s0, 128 }
  0x18   : > { %p760_p2 = pnand %p498_p1, %p936_p4  ;;  %p545_p0 = scmp.ne.s32.totalorder %s933_s0, %s544_s29 }
  0x19   : > { %p551_p9 = scmp.lt.u32.totalorder %s544_s29, %s933_s0 }
  0x1a   : > { %p546_p3 = pneg %p760_p2 }
  0x1c   : > { %p547_p7 = pnand %p546_p3, %p545_p0 }
  0x1e   : > { %p548_p8 = pneg %p547_p7 }
  0x20   : > { %p553_p10 = pnand %p551_p9, %p548_p8 }
  0x22   : > { %556 = shalt.err (!%p553_p10)
}
  0x23   : > { %s557_s6 = scalar_lea.vmem %s111_s25, 128  ;;  %p565_p11 = scmp.lt.s32.totalorder %s111_s25, %s111_s25 }
  0x24   : > { %p558_p1 = scmp.ne.s32.totalorder %s111_s25, %s557_s6  ;;  %p566_p6 = scmp.lt.s32.totalorder %s557_s6, %s557_s6 }
  0x26   : > { %p560_p4 = pnand %p558_p1, %p546_p3  ;;  %p567_p13 = por %p566_p6, %p565_p11 }
  0x28   : > { %p561_p12 = pneg %p560_p4 }
  0x2a   : > { %p568_p5 = pnand %p567_p13, %p561_p12 }
  0x2c   : > { %571 = shalt.err (!%p568_p5)
}
  0x2d   : > { %501 = dma.hbm_to_vmem [thread:$0]  (!%p760_p2), %s933_s0, 128, %s111_s25, [#allocation3]  }
  0x2e   : > { %p403_p0 = scmp.ge.s32.totalorder %s670_s12, 2 }
  0x2f   : > { %p945_p7 = scmp.ne.s32.totalorder (!%p403_p0), %s939_s19, 0 }
  0x30   : > { %117 = sbr.rel (%p403_p0) target bundleno = 90 (0x5a), region = 20 }
  0x37   : > { %120 = sbr.rel (!%p945_p7) target bundleno = 90 (0x5a), region = 24  ;;  %s121_s14 = sand.u32 (%p945_p7), 1, %s666_s11  }
  0x38   : > { %s405_s16 = sshll.u32 (%p945_p7), %s670_s12, 5  ;;  %s404_s17 = sshll.u32 (%p945_p7), %s121_s14, 8 }
  0x39   : > { %s127_s24 = ssub.s32 (%p945_p7), 38, %s405_s16  ;;  %s790_s27 = scalar_lea.sflag (%p945_p7), [#allocation6], %s121_s14 }
  0x3a   : > { %p128_p4 = scmp.lt.s32.totalorder (%p945_p7), %s127_s24, 32  ;;  %s125_s28 = scalar_lea.vmem (%p945_p7), [#allocation5], %s404_s17 }
  0x3e   : > { %s957_s24 = smov (!%p128_p4, %s127_s24), 32 }
  0x3f   : > { %s787_s26 = sshll.u32 %s957_s24, 7 }
  0x40   : > { %s132_s25 = ssub.s32 4096, %s787_s26 }
  0x41   : > { %133 = vsyncadd %s790_s27, %s132_s25  ;;  %p407_p5 = scmp.ne.s32.totalorder %s787_s26, 0  ;;  %s424_s19 = sshll.u32 %s670_s12, 12 }
  0x42   : > { %s798_s3 = scalar_lea.hbm %s934_s1, %s424_s19  ;;  %s138_s4 = sshll.u32 %s125_s28, 4  ;;  %s800_s4 = int_to_ptr.vmem [resolvable:$true] %s138_s4 }
  0x43   : > { %s572_s5 = scalar_lea.hbm %s798_s3, %s787_s26  ;;  %s576_s8 = scalar_lea.hbm %s934_s1, 4864 }
  0x44   : > { %p573_p6 = scmp.ne.s32.totalorder %s798_s3, %s572_s5  ;;  %p577_p13 = scmp.lt.u32.totalorder %s798_s3, %s934_s1 }
  0x45   : > { %p578_p2 = scmp.lt.u32.totalorder %s576_s8, %s572_s5  ;;  %p580_p8 = scmp.lt.u32.totalorder %s572_s5, %s798_s3 }
  0x46   : > { %p574_p11 = pnand %p573_p6, %p407_p5 }
  0x47   : > { %p579_p3 = por %p578_p2, %p577_p13 }
  0x48   : > { %p575_p12 = pneg %p574_p11 }
  0x49   : > { %p581_p9 = por %p580_p8, %p579_p3 }
  0x4b   : > { %p582_p10 = pnand %p581_p9, %p575_p12 }
  0x4d   : > { %585 = shalt.err (!%p582_p10)
}
  0x4e   : > { %s586_s17 = scalar_lea.vmem %s800_s4, %s787_s26  ;;  %s673_s24 = smov [#allocation5]  }
  0x4f   : > { %p587_p1 = scmp.ne.s32.totalorder %s800_s4, %s586_s17  ;;  %s590_s25 = sshll.u32 %s673_s24, 4  ;;  %s591_s25 = int_to_ptr.vmem [resolvable:$false] %s590_s25 }
  0x50   : > { %s592_s28 = scalar_lea.vmem %s591_s25, 8192  ;;  %p593_p6 = scmp.lt.s32.totalorder %s800_s4, %s591_s25 }
  0x51   : > { %p588_p7 = pnand %p587_p1, %p407_p5  ;;  %p594_p11 = scmp.lt.s32.totalorder %s592_s28, %s586_s17 }
  0x53   : > { %p589_p4 = pneg %p588_p7  ;;  %p595_p13 = por %p594_p11, %p593_p6 }
  0x55   : > { %p596_p2 = pnand %p595_p13, %p589_p4 }
  0x57   : > { %599 = shalt.err (!%p596_p2)
}
  0x58   : > { %s674_s19 = smov 128   ;;  %s675_s29 = smov 8  }
  0x59   : > { %144 = dma.hbm_to_vmem [thread:$0]  (%p407_p5), %s798_s3, %s787_s26, %s800_s4, %s790_s27, %s674_s19, %s674_s19, %s675_s29  }
  0x5a PF: > { %p946_p12 = scmp.ne.s32.totalorder %s943_s23, 0 }
  0x5b   : > { %p947_p3 = scmp.eq.s32.totalorder (!%p946_p12), %s713_s13, 0 }
  0x5c   : > { %150 = sbr.rel (%p946_p12) target bundleno = 412 (0x19c), region = 28 }
  0x63   : > { %645 = dma.done.wait (%p947_p3), [#allocation3], 128   ;;  %p948_p8 = pmov %p947_p3 }
  0x64   : > { %s834_s30 = sand.u32 1, %s662_s10   ;;  %p949_p5 = scmp.ne.s32.totalorder %s940_s20, 0 }
  0x65   : > { %647 = vsyncadd (%p948_p8), [#allocation3], 4294967168  ;;  %s413_s5 = sshll.u32 %s834_s30, 8  ;;  %s157_s6 = scalar_lea.sflag [#allocation6], %s834_s30 }
  0x66   : > { %s838_s26 = scalar_lea.vmem [#allocation5], %s413_s5 }
  0x67   : > { %649 = dma.done.wait (%p949_p5), %s157_s6, 4096  }
  0x68   : > { %651 = vsyncadd (%p949_p5), %s157_s6, 4294963200  ;;  %v208_v0 = vld [vmem:[%s838_s26 + $0x80] sm:$0xff]  ;;  %v209_v1 = vld [vmem:[%s838_s26 + $0x88] sm:$0xff]  ;;  %s414_s20 = sshll.u32 %s834_s30, 4  ;;  %s298_s27 = scalar_lea.sflag [#allocation4], %s834_s30 }
  0x69   : > { %v192_v2 = vld [vmem:[%s838_s26] sm:$0xff]  ;;  %v460_v3 = vpack.c.bf16 %v209_v1, %v208_v0  ;;  %v193_v4 = vld [vmem:[%s838_s26 + $0x8] sm:$0xff]  ;;  %v210_v5 = vld [vmem:[%s838_s26 + $0x90] sm:$0xff]  ;;  %s180_s23 = scalar_lea.vmem [#allocation7], %s414_s20  ;;  %p950_p9 = scmp.ne.s32.totalorder %s941_s21, 0 }
  0x6a   : > { %v211_v6 = vld [vmem:[%s838_s26 + $0x98] sm:$0xff]  ;;  %v462_v7 = vpack.c.bf16 %v193_v4, %v192_v2  ;;  %v194_v9 = vld [vmem:[%s838_s26 + $0x10] sm:$0xff]  ;;  %v212_v11 = vld [vmem:[%s838_s26 + $0xa0] sm:$0xff]  ;;  %s416_s3 = sshll.u32 (%p950_p9), %s713_s13, 1 }
  0x6b   : > { %v464_v8 = vpack.c.bf16 %v211_v6, %v210_v5  ;;  %461 = vmatprep.subr.bf16.mxu0 %v460_v3  ;;  %v195_v10 = vld [vmem:[%s838_s26 + $0x18] sm:$0xff]  ;;  %v213_v12 = vld [vmem:[%s838_s26 + $0xa8] sm:$0xff]  ;;  %v196_v16 = vld [vmem:[%s838_s26 + $0x20] sm:$0xff]  ;;  %s306_s4 = ssub.s32 (%p950_p9), 3, %s416_s3 }
  0x6c   : > { %463 = vmatpush3.bf16.xpose.msra.mxu0 %v462_v7  ;;  %v466_v13 = vpack.c.bf16 %v195_v10, %v194_v9  ;;  %v468_v14 = vpack.c.bf16 %v213_v12, %v212_v11  ;;  %v191_v15 = vld [vmem:[#allocation2] sm:$0xff]  ;;  %v197_v17 = vld [vmem:[%s838_s26 + $0x28] sm:$0xff]  ;;  %v214_v18 = vld [vmem:[%s838_s26 + $0xb0] sm:$0xff]  ;;  %p307_p10 = scmp.lt.s32.totalorder (%p950_p9), %s306_s4, 2 }
  0x6d   : > { %465 = vmatprep.subr.bf16.mxu0 %v464_v8  ;;  %458 = vmatprep.mubr.f32.mxu0 %v191_v15  ;;  %v215_v19 = vld [vmem:[%s838_s26 + $0xb8] sm:$0xff]  ;;  %v470_v20 = vpack.c.bf16 %v197_v17, %v196_v16  ;;  %v198_v22 = vld [vmem:[%s838_s26 + $0x30] sm:$0xff]  ;;  %v216_v24 = vld [vmem:[%s838_s26 + $0xc0] sm:$0xff] }
  0x6e   : > { %v472_v21 = vpack.c.bf16 %v215_v19, %v214_v18  ;;  %v199_v23 = vld [vmem:[%s838_s26 + $0x38] sm:$0xff]  ;;  %v217_v25 = vld [vmem:[%s838_s26 + $0xc8] sm:$0xff]  ;;  %v200_v28 = vld [vmem:[%s838_s26 + $0x40] sm:$0xff] }
  0x6f   : > { %v474_v26 = vpack.c.bf16 %v199_v23, %v198_v22  ;;  %v476_v27 = vpack.c.bf16 %v217_v25, %v216_v24  ;;  %v201_v29 = vld [vmem:[%s838_s26 + $0x48] sm:$0xff]  ;;  %v218_v30 = vld [vmem:[%s838_s26 + $0xd0] sm:$0xff]  ;;  %v219_v31 = vld [vmem:[%s838_s26 + $0xd8] sm:$0xff] }
  0x70   : > { %v478_v32 = vpack.c.bf16 %v201_v29, %v200_v28  ;;  %v480_v33 = vpack.c.bf16 %v219_v31, %v218_v30  ;;  %v202_v34 = vld [vmem:[%s838_s26 + $0x50] sm:$0xff]  ;;  %v203_v35 = vld [vmem:[%s838_s26 + $0x58] sm:$0xff]  ;;  %v220_v36 = vld [vmem:[%s838_s26 + $0xe0] sm:$0xff] }
  0x71   : > { %v221_v37 = vld [vmem:[%s838_s26 + $0xe8] sm:$0xff]  ;;  %v482_v38 = vpack.c.bf16 %v203_v35, %v202_v34  ;;  %v204_v40 = vld [vmem:[%s838_s26 + $0x60] sm:$0xff]  ;;  %v222_v42 = vld [vmem:[%s838_s26 + $0xf0] sm:$0xff] }
  0x72   : > { %v484_v39 = vpack.c.bf16 %v221_v37, %v220_v36  ;;  %v205_v41 = vld [vmem:[%s838_s26 + $0x68] sm:$0xff]  ;;  %v223_v43 = vld [vmem:[%s838_s26 + $0xf8] sm:$0xff]  ;;  %v206_v46 = vld [vmem:[%s838_s26 + $0x70] sm:$0xff] }
  0x73   : > { %v486_v44 = vpack.c.bf16 %v205_v41, %v204_v40  ;;  %v488_v45 = vpack.c.bf16 %v223_v43, %v222_v42  ;;  %v207_v47 = vld [vmem:[%s838_s26 + $0x78] sm:$0xff] }
  0x74   : > { %467 = vmatpush3.bf16.xpose.msra.mxu0 %v466_v13  ;;  %v490_v48 = vpack.c.bf16 %v207_v47, %v206_v46 }
  0x75   : > { %469 = vmatprep.subr.bf16.mxu0 %v468_v14 }
  0x7c   : > { %471 = vmatpush3.bf16.xpose.msra.mxu0 %v470_v20 }
  0x7d   : > { %473 = vmatprep.subr.bf16.mxu0 %v472_v21 }
  0x84   : > { %475 = vmatpush3.bf16.xpose.msra.mxu0 %v474_v26 }
  0x85   : > { %477 = vmatprep.subr.bf16.mxu0 %v476_v27 }
  0x8c   : > { %479 = vmatpush3.bf16.xpose.msra.mxu0 %v478_v32 }
  0x8d   : > { %481 = vmatprep.subr.bf16.mxu0 %v480_v33 }
  0x94   : > { %483 = vmatpush3.bf16.xpose.msra.mxu0 %v482_v38 }
  0x95   : > { %485 = vmatprep.subr.bf16.mxu0 %v484_v39 }
  0x9c   : > { %487 = vmatpush3.bf16.xpose.msra.mxu0 %v486_v44 }
  0x9d   : > { %489 = vmatprep.subr.bf16.mxu0 %v488_v45 }
  0xa4   : > { %491 = vmatpush3.bf16.xpose.msra.mxu0 %v490_v48 }
  0xab   : > { %459 = vmatmul.mubr.f32.vlgmr.msra.gmra.mrb[0].mxu0 %v191_v15 }
 0x17a   : > { %304 = sbr.rel (!%p950_p9) target bundleno = 412 (0x19c), region = 40 }
 0x17e   : > { %v290_v49 = vpop.f32.mrb[0].mxu0 }
 0x17f   : > { %295 = vst [vmem:[%s180_s23] sm:$0xff] %v290_v49  ;;  %v292_v50 = vpop.f32.mrb[1].mxu0 }
 0x180   : > { %296 = vst [vmem:[%s180_s23 + $0x8] sm:$0xff] %v292_v50 }
 0x181   : > { %s959_s4 = smov (!%p307_p10, %s306_s4), 2 }
 0x182   : > { %s881_s7 = sshll.u32 %s959_s4, 7 }
 0x183   : > { %s311_s8 = ssub.s32 256, %s881_s7 }
 0x184   : > { %312 = vsyncadd %s298_s27, %s311_s8  ;;  %p418_p1 = scmp.ne.s32.totalorder %s881_s7, 0  ;;  %s425_s14 = sshll.u32 %s713_s13, 8 }
 0x185   : > { %s891_s17 = scalar_lea.hbm %s935_s2, %s425_s14  ;;  %s318_s24 = sshll.u32 %s180_s23, 4  ;;  %s319_s24 = int_to_ptr.vmem [resolvable:$true] %s318_s24 }
 0x186   : > { %s600_s25 = scalar_lea.vmem %s319_s24, %s881_s7  ;;  %s676_s28 = smov [#allocation7]  }
 0x187   : > { %p601_p7 = scmp.ne.s32.totalorder %s319_s24, %s600_s25  ;;  %s604_s19 = sshll.u32 %s676_s28, 4  ;;  %s605_s19 = int_to_ptr.vmem [resolvable:$false] %s604_s19 }
 0x188   : > { %s606_s29 = scalar_lea.vmem %s605_s19, 512  ;;  %p607_p11 = scmp.lt.s32.totalorder %s319_s24, %s605_s19 }
 0x189   : > { %p602_p4 = pnand %p601_p7, %p418_p1  ;;  %p608_p13 = scmp.lt.s32.totalorder %s606_s29, %s600_s25 }
 0x18b   : > { %p603_p6 = pneg %p602_p4  ;;  %p609_p2 = por %p608_p13, %p607_p11 }
 0x18d   : > { %p610_p12 = pnand %p609_p2, %p603_p6 }
 0x18f   : > { %613 = shalt.err (!%p610_p12)
}
 0x190   : > { %s614_s13 = scalar_lea.hbm %s891_s17, %s881_s7  ;;  %s618_s26 = scalar_lea.hbm %s935_s2, 384 }
 0x191   : > { %p615_p3 = scmp.ne.s32.totalorder %s891_s17, %s614_s13  ;;  %p619_p9 = scmp.lt.u32.totalorder %s891_s17, %s935_s2 }
 0x192   : > { %p620_p10 = scmp.lt.u32.totalorder %s618_s26, %s614_s13  ;;  %p622_p4 = scmp.lt.u32.totalorder %s614_s13, %s891_s17 }
 0x193   : > { %p616_p8 = pnand %p615_p3, %p418_p1 }
 0x194   : > { %p621_p7 = por %p620_p10, %p619_p9 }
 0x195   : > { %p617_p5 = pneg %p616_p8 }
 0x196   : > { %p623_p6 = por %p622_p4, %p621_p7 }
 0x198   : > { %p624_p11 = pnand %p623_p6, %p617_p5 }
 0x19a   : > { %627 = shalt.err (!%p624_p11)
}
 0x19b   : > { %321 = dma.vmem_to_hbm [thread:$0]  (%p418_p1), %s319_s24, %s881_s7, %s891_s17, %s298_s27  }
 0x19c PF: > { %s330_s3 = sand.u32 1, %s658_s9   ;;  %p951_p13 = scmp.ne.s32.totalorder %s942_s22, 0 }
 0x19d   : > { %s331_s4 = scalar_lea.sflag [#allocation4], %s330_s3 }
 0x19e   : > { %p503_p2 = pnand %p403_p0, %p951_p13 }
 0x1a0   : > { %653 = dma.done.wait (!%p503_p2), %s331_s4, 256  }
 0x1a1   : > { %655 = vsyncadd (!%p503_p2), %s331_s4, 4294967040  ;;  %p16_p12 = scmp.ge.s32.totalorder %s717_s15, 4   ;;  %s952_s9 = smov %s662_s10 }
 0x1a2   : > { %s953_s10 = smov %s666_s11  ;;  %s954_s11 = smov %s729_s18 }
 0x1a3   : > { %s955_s12 = smov %s717_s15  ;;  %18 = sbr.rel (!%p16_p12) target bundleno = 6 (0x6), region = 78 }
 0x1aa   :  { %336 = vsyncpa [#allocation3], 1 }
 0x1ab   :  { %338 = vsyncpa [#allocation3 + $0x1], 1 }
 0x1ac   :  { %339 = vsyncpa [#allocation6], 1 }
 0x1ad   :  { %341 = vsyncpa [#allocation6 + $0x1], 1 }
 0x1ae   :  { %342 = vsyncpa [#allocation4], 1 }
 0x1af   :  { %344 = vsyncpa [#allocation4 + $0x1], 1 }

</bundles_post_ra>
